<compile_context>
chip_gen: v7x
topology: tpu7x:2x2x1
jax: 0.10.0
libtpu: 0.0.40
codegen_flags: <defaults>
</compile_context>

<pallas_src>
import math

import numpy as np
import jax
import jax.numpy as jnp
from jax.experimental import pallas as pl
from jax.experimental.pallas import tpu as pltpu


# ----------------------------------------------------------------------------
# Fused per-block kernel:  [conv_in] + Resnet1D(depth) + ConvTranspose1d
# ----------------------------------------------------------------------------
def _make_block_kernel(*, has_conv_in, dilations, res_scale, halo):
    P = halo
    n_params = (2 if has_conv_in else 0) + 4 * len(dilations) + 4

    def kernel(x_ref, *refs):
        assert len(refs) == n_params + 2
        o_ref, xa_ref = refs[-2], refs[-1]
        it = iter(refs[:n_params])
        T = o_ref.shape[1]

        # ---- stage 0: block input -> core activation (T, width), f32 --------
        if has_conv_in:
            w = next(it)                        # (3, Cin, width) ref
            b = next(it)[...]                   # (1, width)
            xin = x_ref[0]                      # (T + 2, Cin); wrapper zero-pads by 1
            core = jnp.dot(xin[0:T, :], w[0], preferred_element_type=jnp.float32)
            core = core + jnp.dot(xin[1:T + 1, :], w[1],
                                  preferred_element_type=jnp.float32)
            core = core + jnp.dot(xin[2:T + 2, :], w[2],
                                  preferred_element_type=jnp.float32)
            core = core + b
        else:
            core = x_ref[0].astype(jnp.float32)  # (T, width)

        # ---- zero-haloed resident activation in VMEM scratch -----------------
        # rows [P, P+T) hold x; halo rows stay exactly zero (conv 'same' padding).
        xa_ref[...] = jnp.zeros_like(xa_ref)
        xa_ref[pl.ds(P, T), :] = core

        # ---- Resnet1D: depth x (ReLU -> dilated Conv3 -> ReLU -> 1x1 -> +res) -
        for dil in dilations:
            w1 = next(it)                        # (3, width, n_state) ref
            b1 = next(it)[...]                   # (1, n_state)
            w2 = next(it)[...]                   # (n_state, width)
            b2 = next(it)[...]                   # (1, width)
            xr = jnp.maximum(xa_ref[...], 0.0)   # ReLU; zero halo preserved
            h = jnp.dot(xr[P - dil:P - dil + T, :], w1[0],
                        preferred_element_type=jnp.float32)
            h = h + jnp.dot(xr[P:P + T, :], w1[1],
                            preferred_element_type=jnp.float32)
            h = h + jnp.dot(xr[P + dil:P + dil + T, :], w1[2],
                            preferred_element_type=jnp.float32)
            h = jnp.maximum(h + b1, 0.0)         # bias once, then ReLU
            y = jnp.dot(h, w2, preferred_element_type=jnp.float32) + b2
            if res_scale != 1.0:
                y = res_scale * y
            xa_ref[pl.ds(P, T), :] = xa_ref[pl.ds(P, T), :] + y

        # ---- ConvTranspose1d (even stride s, filter 2s, pad s//2) ------------
        # Phase-packed output:  out[t*s + p, :] = y[t, p*Cout:(p+1)*Cout]
        w_main = next(it)[...]                   # (width, s*Cout)
        w_prev = next(it)[...]                   # (width, s*Cout)  zero-padded phases
        w_next = next(it)[...]                   # (width, s*Cout)  zero-padded phases
        b_tile = next(it)[...]                   # (1, s*Cout)
        y = jnp.dot(xa_ref[pl.ds(P, T), :], w_main,
                    preferred_element_type=jnp.float32)
        y = y + jnp.dot(xa_ref[pl.ds(P - 1, T), :], w_prev,
                        preferred_element_type=jnp.float32)
        y = y + jnp.dot(xa_ref[pl.ds(P + 1, T), :], w_next,
                        preferred_element_type=jnp.float32)
        o_ref[0] = (y + b_tile).astype(o_ref.dtype)

    return kernel


def _run_block(x_ntc, flat_params, *, has_conv_in, dilations, res_scale, stride):
    N, T, Cin = x_ntc.shape
    # one small pad of the block-0 input (halo for the 3-tap conv_in); no per-layer pads
    x_in = jnp.pad(x_ntc, ((0, 0), (1, 1), (0, 0))) if has_conv_in else x_ntc
    Tp_in = x_in.shape[1]
    halo = max([1] + [int(d) for d in dilations])
    width = flat_params[-4].shape[0]          # rows of w_main
    wide = flat_params[-1].shape[-1]          # s * Cout

    kernel = _make_block_kernel(has_conv_in=has_conv_in, dilations=tuple(dilations),
                                res_scale=float(res_scale), halo=halo)
    in_specs = [pl.BlockSpec((1, Tp_in, Cin), lambda n: (n, 0, 0))]
    for p in flat_params:
        nd = p.ndim
        in_specs.append(pl.BlockSpec(p.shape, lambda n, _nd=nd: (0,) * _nd))

    out = pl.pallas_call(
        kernel,
        out_shape=jax.ShapeDtypeStruct((N, T, wide), x_ntc.dtype),
        grid=(N,),
        in_specs=in_specs,
        out_specs=pl.BlockSpec((1, T, wide), lambda n: (n, 0, 0)),
        scratch_shapes=[pltpu.VMEM((T + 2 * halo, width), jnp.float32)],
        compiler_params=pltpu.CompilerParams(dimension_semantics=("parallel",)),
    )(x_in, *flat_params)
    # (N, T, s*Cout) -> (N, T*s, Cout): free row-major reshape, no transpose.
    return out.reshape(N, T * stride, wide // stride)


# ----------------------------------------------------------------------------
# Host-side parameter packing (phase-concatenated conv-transpose weights etc.)
# ----------------------------------------------------------------------------
def prepare_params(params, cfg):
    s = cfg["stride_t"]
    assert not isinstance(s, (tuple, list)), "tuple/list stride_t not implemented"
    assert s % 2 == 0 and s >= 2, "only even stride_t >= 2 supported"
    half = s // 2
    blocks = []
    for i, blk in enumerate(params["blocks"]):
        flat = []
        if i == 0:
            flat += [params["conv_in_w"], params["conv_in_b"].reshape(1, -1)]
        for rb in blk["res_blocks"]:
            flat += [rb["w1"], rb["b1"].reshape(1, -1), rb["w2"], rb["b2"].reshape(1, -1)]
        wt, bt = blk["wt"], blk["bt"]            # wt: (2s, Cin, Cout)
        cout = wt.shape[-1]
        zero_tap = jnp.zeros_like(wt[0])
        # out[t*s + p] = x[t] @ W[p+half]
        #             + (x[t-1] @ W[p+s+half] if p <  half else 0)
        #             + (x[t+1] @ W[p-half]   if p >= half else 0)
        w_main = jnp.concatenate([wt[p + half] for p in range(s)], axis=-1)
        w_prev = jnp.concatenate([wt[p + s + half] if p < half else zero_tap
                                  for p in range(s)], axis=-1)
        w_next = jnp.concatenate([zero_tap if p < half else wt[p - half]
                                  for p in range(s)], axis=-1)
        b_tiled = jnp.tile(bt, s).reshape(1, s * cout)
        flat += [w_main, w_prev, w_next, b_tiled]
        blocks.append({"flat": flat,
                       "dilations": tuple(int(d) for d in blk["dilations"])})
    return blocks


# ----------------------------------------------------------------------------
# DecoderConvBock forward
# ----------------------------------------------------------------------------
def decoder_conv_block_forward(x_nct, params, cfg):
    blocks = prepare_params(params, cfg)
    x = jnp.transpose(x_nct, (0, 2, 1))          # NCT -> NTC (boundary only)
    for i, blk in enumerate(blocks):
        x = _run_block(x, blk["flat"],
                       has_conv_in=(i == 0),
                       dilations=blk["dilations"],
                       res_scale=cfg["res_scale_val"],
                       stride=cfg["stride_t"])
    return jnp.transpose(x, (0, 2, 1))           # NTC -> NCT


# ----------------------------------------------------------------------------
# Deterministic parameter init (shapes from the module's __init__)
# ----------------------------------------------------------------------------
def init_params(key, cfg):
    width, depth = cfg["width"], cfg["depth"]
    n_state = int(cfg["m_conv"] * width)
    f_t = cfg["stride_t"] * 2

    def uconv(k, K, cin, cout):
        bound = 1.0 / math.sqrt(cin * K)
        kw, kb = jax.random.split(k)
        w = jax.random.uniform(kw, (K, cin, cout), jnp.float32, -bound, bound)
        b = jax.random.uniform(kb, (cout,), jnp.float32, -bound, bound)
        return w, b

    keys = iter(jax.random.split(key, 1 + cfg["down_t"] * (2 * depth + 1)))
    params = {}
    params["conv_in_w"], params["conv_in_b"] = uconv(
        next(keys), 3, cfg["output_emb_width"], width)
    blocks = []
    for i in range(cfg["down_t"]):
        res_blocks, dils = [], []
        for d in range(depth):
            dd = d if cfg["dilation_cycle"] is None else d % cfg["dilation_cycle"]
            dil = cfg["dilation_growth_rate"] ** dd
            w1, b1 = uconv(next(keys), 3, width, n_state)
            w2, b2 = uconv(next(keys), 1, n_state, width)
            res_blocks.append({"w1": w1, "b1": b1, "w2": w2[0], "b2": b2})
            dils.append(dil)
        if cfg["reverse_decoder_dilation"]:
            res_blocks, dils = res_blocks[::-1], dils[::-1]
        out_ch = cfg["input_emb_width"] if i == cfg["down_t"] - 1 else width
        wt, bt = uconv(next(keys), f_t, width, out_ch)
        blocks.append({"res_blocks": res_blocks, "dilations": dils,
                       "wt": wt, "bt": bt})
    params["blocks"] = blocks
    return params


# ----------------------------------------------------------------------------
# Pure numpy reference (direct PyTorch semantics) for verification
# ----------------------------------------------------------------------------
def np_conv1d(x, w, b, dilation, pad, relu_in):
    if relu_in:
        x = np.maximum(x, 0.0)
    K = w.shape[0]
    T = x.shape[1]
    xp = np.pad(x, ((0, 0), (pad, pad), (0, 0)))
    Tout = T + 2 * pad - dilation * (K - 1)
    y = np.broadcast_to(b[None, None, :], (x.shape[0], Tout, w.shape[2])).copy()
    for k in range(K):
        y = y + xp[:, k * dilation:k * dilation + Tout, :] @ w[k]
    return y.astype(np.float32)


def np_conv_transpose1d(x, w, b, stride):
    N, T, Cin = x.shape
    f, _, Cout = w.shape
    pad = stride // 2
    Tout = (T - 1) * stride - 2 * pad + f
    y = np.zeros((N, Tout, Cout), np.float32)
    for t_in in range(T):
        for k in range(f):
            t_out = t_in * stride - pad + k
            if 0 <= t_out < Tout:
                y[:, t_out, :] += x[:, t_in, :] @ w[k]
    return y + b[None, None, :]


def np_decoder(x_nct, params, cfg):
    p = jax.tree_util.tree_map(np.asarray, params)
    x = np.transpose(np.asarray(x_nct), (0, 2, 1)).astype(np.float32)
    x = np_conv1d(x, p["conv_in_w"], p["conv_in_b"], 1, 1, False)
    for blk in p["blocks"]:
        for rb, dil in zip(blk["res_blocks"], blk["dilations"]):
            h = np_conv1d(x, rb["w1"], rb["b1"], int(dil), int(dil), True)
            h2 = np_conv1d(np.maximum(h, 0.0), rb["w2"][None], rb["b2"], 1, 0, False)
            x = x + cfg["res_scale_val"] * h2
        x = np_conv_transpose1d(x, blk["wt"], blk["bt"], cfg["stride_t"])
    return np.transpose(x, (0, 2, 1))


# ----------------------------------------------------------------------------
if __name__ == "__main__":
    cfg = dict(
        input_emb_width=4,     # final output channels
        output_emb_width=8,    # input channels to the decoder block
        down_t=2,
        stride_t=2,
        width=32,
        depth=2,
        m_conv=1.0,
        dilation_growth_rate=3,
        dilation_cycle=None,
        zero_out=False,
        res_scale=False,
        reverse_decoder_dilation=False,
    )
    cfg["res_scale_val"] = 1.0 if not cfg["res_scale"] else 1.0 / math.sqrt(cfg["depth"])

    key = jax.random.PRNGKey(0)
    kx, kp = jax.random.split(key)
    N, T = 2, 8
    x = jax.random.normal(kx, (N, cfg["output_emb_width"], T), jnp.float32)  # NCT

    params = init_params(kp, cfg)

    out = decoder_conv_block_forward(x, params, cfg)
    out = jax.block_until_ready(out)

    # shape check: T upsampled by stride_t**down_t, channels -> input_emb_width
    expected_shape = (N, cfg["input_emb_width"], T * cfg["stride_t"] ** cfg["down_t"])
    assert out.shape == expected_shape, (out.shape, expected_shape)

    ref = np_decoder(x, params, cfg)
    np.testing.assert_allclose(np.asarray(out), ref, rtol=5e-3, atol=5e-3)

    print("KERNEL_OK")
</pallas_src>

<mosaic_0001>
module attributes {stable_mosaic.version = 11 : i64} {
  func.func @kernel(%arg0: i32, %arg1: memref<1x10x8xf32, #tpu.memory_space<vmem>>, %arg2: memref<3x8x32xf32, #tpu.memory_space<vmem>>, %arg3: memref<1x32xf32, #tpu.memory_space<vmem>>, %arg4: memref<3x32x32xf32, #tpu.memory_space<vmem>>, %arg5: memref<1x32xf32, #tpu.memory_space<vmem>>, %arg6: memref<32x32xf32, #tpu.memory_space<vmem>>, %arg7: memref<1x32xf32, #tpu.memory_space<vmem>>, %arg8: memref<3x32x32xf32, #tpu.memory_space<vmem>>, %arg9: memref<1x32xf32, #tpu.memory_space<vmem>>, %arg10: memref<32x32xf32, #tpu.memory_space<vmem>>, %arg11: memref<1x32xf32, #tpu.memory_space<vmem>>, %arg12: memref<32x64xf32, #tpu.memory_space<vmem>>, %arg13: memref<32x64xf32, #tpu.memory_space<vmem>>, %arg14: memref<32x64xf32, #tpu.memory_space<vmem>>, %arg15: memref<1x64xf32, #tpu.memory_space<vmem>>, %arg16: memref<1x8x64xf32, #tpu.memory_space<vmem>>, %arg17: memref<14x32xf32, #tpu.memory_space<vmem>>) attributes {dimension_semantics = [#tpu.dimension_semantics<parallel>], iteration_bounds = array<i64: 2>, scalar_prefetch = 0 : i64, scratch_operands = 1 : i64, tpu.core_type = #tpu.core_type<tc>, window_params = [{transform_indices = @transform_0, window_bounds = array<i64: 1, 10, 8>}, {pipeline_mode = #tpu.pipeline_mode<synchronous>, transform_indices = @transform_1, window_bounds = array<i64: 3, 8, 32>}, {pipeline_mode = #tpu.pipeline_mode<synchronous>, transform_indices = @transform_2, window_bounds = array<i64: 1, 32>}, {pipeline_mode = #tpu.pipeline_mode<synchronous>, transform_indices = @transform_3, window_bounds = array<i64: 3, 32, 32>}, {pipeline_mode = #tpu.pipeline_mode<synchronous>, transform_indices = @transform_4, window_bounds = array<i64: 1, 32>}, {pipeline_mode = #tpu.pipeline_mode<synchronous>, transform_indices = @transform_5, window_bounds = array<i64: 32, 32>}, {pipeline_mode = #tpu.pipeline_mode<synchronous>, transform_indices = @transform_6, window_bounds = array<i64: 1, 32>}, {pipeline_mode = #tpu.pipeline_mode<synchronous>, transform_indices = @transform_7, window_bounds = array<i64: 3, 32, 32>}, {pipeline_mode = #tpu.pipeline_mode<synchronous>, transform_indices = @transform_8, window_bounds = array<i64: 1, 32>}, {pipeline_mode = #tpu.pipeline_mode<synchronous>, transform_indices = @transform_9, window_bounds = array<i64: 32, 32>}, {pipeline_mode = #tpu.pipeline_mode<synchronous>, transform_indices = @transform_10, window_bounds = array<i64: 1, 32>}, {pipeline_mode = #tpu.pipeline_mode<synchronous>, transform_indices = @transform_11, window_bounds = array<i64: 32, 64>}, {pipeline_mode = #tpu.pipeline_mode<synchronous>, transform_indices = @transform_12, window_bounds = array<i64: 32, 64>}, {pipeline_mode = #tpu.pipeline_mode<synchronous>, transform_indices = @transform_13, window_bounds = array<i64: 32, 64>}, {pipeline_mode = #tpu.pipeline_mode<synchronous>, transform_indices = @transform_14, window_bounds = array<i64: 1, 64>}, {transform_indices = @transform_15, window_bounds = array<i64: 1, 8, 64>}]} {
    %c0 = arith.constant 0 : index
    %c0_0 = arith.constant 0 : index
    %0 = vector.load %arg3[%c0, %c0_0] : memref<1x32xf32, #tpu.memory_space<vmem>>, vector<1x32xf32>
    %c0_1 = arith.constant 0 : index
    %c0_2 = arith.constant 0 : index
    %c0_3 = arith.constant 0 : index
    %1 = vector.load %arg1[%c0_1, %c0_2, %c0_3] : memref<1x10x8xf32, #tpu.memory_space<vmem>>, vector<1x10x8xf32>
    %2 = vector.shape_cast %1 : vector<1x10x8xf32> to vector<10x8xf32>
    %3 = vector.extract_strided_slice %2 {offsets = [0, 0], sizes = [8, 8], strides = [1, 1]} : vector<10x8xf32> to vector<8x8xf32>
    %c0_4 = arith.constant 0 : index
    %c0_5 = arith.constant 0 : index
    %c0_6 = arith.constant 0 : index
    %4 = vector.load %arg2[%c0_4, %c0_5, %c0_6] : memref<3x8x32xf32, #tpu.memory_space<vmem>>, vector<1x8x32xf32>
    %5 = vector.shape_cast %4 : vector<1x8x32xf32> to vector<8x32xf32>
    %cst = arith.constant dense<0.000000e+00> : vector<8x32xf32>
    %6 = tpu.matmul %3, %5, %cst {dimension_numbers = #tpu.dot_dimension_numbers<[1], [0], [0], [1], [0, 0, 1, 1], [], []>} : vector<8x8xf32>, vector<8x32xf32>, vector<8x32xf32> -> vector<8x32xf32>
    %7 = vector.extract_strided_slice %2 {offsets = [1, 0], sizes = [8, 8], strides = [1, 1]} : vector<10x8xf32> to vector<8x8xf32>
    %c1 = arith.constant 1 : index
    %c0_7 = arith.constant 0 : index
    %c0_8 = arith.constant 0 : index
    %8 = vector.load %arg2[%c1, %c0_7, %c0_8] : memref<3x8x32xf32, #tpu.memory_space<vmem>>, vector<1x8x32xf32>
    %9 = vector.shape_cast %8 : vector<1x8x32xf32> to vector<8x32xf32>
    %cst_9 = arith.constant dense<0.000000e+00> : vector<8x32xf32>
    %10 = tpu.matmul %7, %9, %cst_9 {dimension_numbers = #tpu.dot_dimension_numbers<[1], [0], [0], [1], [0, 0, 1, 1], [], []>} : vector<8x8xf32>, vector<8x32xf32>, vector<8x32xf32> -> vector<8x32xf32>
    %11 = arith.addf %6, %10 : vector<8x32xf32>
    %12 = vector.extract_strided_slice %2 {offsets = [2, 0], sizes = [8, 8], strides = [1, 1]} : vector<10x8xf32> to vector<8x8xf32>
    %c2 = arith.constant 2 : index
    %c0_10 = arith.constant 0 : index
    %c0_11 = arith.constant 0 : index
    %13 = vector.load %arg2[%c2, %c0_10, %c0_11] : memref<3x8x32xf32, #tpu.memory_space<vmem>>, vector<1x8x32xf32>
    %14 = vector.shape_cast %13 : vector<1x8x32xf32> to vector<8x32xf32>
    %cst_12 = arith.constant dense<0.000000e+00> : vector<8x32xf32>
    %15 = tpu.matmul %12, %14, %cst_12 {dimension_numbers = #tpu.dot_dimension_numbers<[1], [0], [0], [1], [0, 0, 1, 1], [], []>} : vector<8x8xf32>, vector<8x32xf32>, vector<8x32xf32> -> vector<8x32xf32>
    %16 = arith.addf %11, %15 : vector<8x32xf32>
    %17 = vector.broadcast %0 : vector<1x32xf32> to vector<8x32xf32>
    %18 = arith.addf %16, %17 : vector<8x32xf32>
    %cst_13 = arith.constant 0.000000e+00 : f32
    %19 = vector.broadcast %cst_13 : f32 to vector<14x32xf32>
    %c0_14 = arith.constant 0 : index
    %c0_15 = arith.constant 0 : index
    %20 = vector.load %arg17[%c0_14, %c0_15] : memref<14x32xf32, #tpu.memory_space<vmem>>, vector<14x32xf32>
    tpu.vector_store %arg17[%c0_14, %c0_15], %19 {strides = array<i32>} : memref<14x32xf32, #tpu.memory_space<vmem>>, vector<14x32xf32>,
    %c3 = arith.constant 3 : index
    %c0_16 = arith.constant 0 : index
    %21 = vector.load %arg17[%c3, %c0_16] : memref<14x32xf32, #tpu.memory_space<vmem>>, vector<8x32xf32>
    tpu.vector_store %arg17[%c3, %c0_16], %18 {strides = array<i32>} : memref<14x32xf32, #tpu.memory_space<vmem>>, vector<8x32xf32>,
    %c0_17 = arith.constant 0 : index
    %c0_18 = arith.constant 0 : index
    %22 = vector.load %arg5[%c0_17, %c0_18] : memref<1x32xf32, #tpu.memory_space<vmem>>, vector<1x32xf32>
    %c0_19 = arith.constant 0 : index
    %c0_20 = arith.constant 0 : index
    %23 = vector.load %arg6[%c0_19, %c0_20] : memref<32x32xf32, #tpu.memory_space<vmem>>, vector<32x32xf32>
    %c0_21 = arith.constant 0 : index
    %c0_22 = arith.constant 0 : index
    %24 = vector.load %arg7[%c0_21, %c0_22] : memref<1x32xf32, #tpu.memory_space<vmem>>, vector<1x32xf32>
    %c0_23 = arith.constant 0 : index
    %c0_24 = arith.constant 0 : index
    %25 = vector.load %arg17[%c0_23, %c0_24] : memref<14x32xf32, #tpu.memory_space<vmem>>, vector<14x32xf32>
    %cst_25 = arith.constant 0.000000e+00 : f32
    %26 = vector.broadcast %cst_25 : f32 to vector<14x32xf32>
    %27 = arith.maximumf %25, %26 : vector<14x32xf32>
    %28 = vector.extract_strided_slice %27 {offsets = [2, 0], sizes = [8, 32], strides = [1, 1]} : vector<14x32xf32> to vector<8x32xf32>
    %c0_26 = arith.constant 0 : index
    %c0_27 = arith.constant 0 : index
    %c0_28 = arith.constant 0 : index
    %29 = vector.load %arg4[%c0_26, %c0_27, %c0_28] : memref<3x32x32xf32, #tpu.memory_space<vmem>>, vector<1x32x32xf32>
    %30 = vector.shape_cast %29 : vector<1x32x32xf32> to vector<32x32xf32>
    %cst_29 = arith.constant dense<0.000000e+00> : vector<8x32xf32>
    %31 = tpu.matmul %28, %30, %cst_29 {dimension_numbers = #tpu.dot_dimension_numbers<[1], [0], [0], [1], [0, 0, 1, 1], [], []>} : vector<8x32xf32>, vector<32x32xf32>, vector<8x32xf32> -> vector<8x32xf32>
    %32 = vector.extract_strided_slice %27 {offsets = [3, 0], sizes = [8, 32], strides = [1, 1]} : vector<14x32xf32> to vector<8x32xf32>
    %c1_30 = arith.constant 1 : index
    %c0_31 = arith.constant 0 : index
    %c0_32 = arith.constant 0 : index
    %33 = vector.load %arg4[%c1_30, %c0_31, %c0_32] : memref<3x32x32xf32, #tpu.memory_space<vmem>>, vector<1x32x32xf32>
    %34 = vector.shape_cast %33 : vector<1x32x32xf32> to vector<32x32xf32>
    %cst_33 = arith.constant dense<0.000000e+00> : vector<8x32xf32>
    %35 = tpu.matmul %32, %34, %cst_33 {dimension_numbers = #tpu.dot_dimension_numbers<[1], [0], [0], [1], [0, 0, 1, 1], [], []>} : vector<8x32xf32>, vector<32x32xf32>, vector<8x32xf32> -> vector<8x32xf32>
    %36 = arith.addf %31, %35 : vector<8x32xf32>
    %37 = vector.extract_strided_slice %27 {offsets = [4, 0], sizes = [8, 32], strides = [1, 1]} : vector<14x32xf32> to vector<8x32xf32>
    %c2_34 = arith.constant 2 : index
    %c0_35 = arith.constant 0 : index
    %c0_36 = arith.constant 0 : index
    %38 = vector.load %arg4[%c2_34, %c0_35, %c0_36] : memref<3x32x32xf32, #tpu.memory_space<vmem>>, vector<1x32x32xf32>
    %39 = vector.shape_cast %38 : vector<1x32x32xf32> to vector<32x32xf32>
    %cst_37 = arith.constant dense<0.000000e+00> : vector<8x32xf32>
    %40 = tpu.matmul %37, %39, %cst_37 {dimension_numbers = #tpu.dot_dimension_numbers<[1], [0], [0], [1], [0, 0, 1, 1], [], []>} : vector<8x32xf32>, vector<32x32xf32>, vector<8x32xf32> -> vector<8x32xf32>
    %41 = arith.addf %36, %40 : vector<8x32xf32>
    %42 = vector.broadcast %22 : vector<1x32xf32> to vector<8x32xf32>
    %43 = arith.addf %41, %42 : vector<8x32xf32>
    %cst_38 = arith.constant 0.000000e+00 : f32
    %44 = vector.broadcast %cst_38 : f32 to vector<8x32xf32>
    %45 = arith.maximumf %43, %44 : vector<8x32xf32>
    %cst_39 = arith.constant dense<0.000000e+00> : vector<8x32xf32>
    %46 = tpu.matmul %45, %23, %cst_39 {dimension_numbers = #tpu.dot_dimension_numbers<[1], [0], [0], [1], [0, 0, 1, 1], [], []>} : vector<8x32xf32>, vector<32x32xf32>, vector<8x32xf32> -> vector<8x32xf32>
    %47 = vector.broadcast %24 : vector<1x32xf32> to vector<8x32xf32>
    %48 = arith.addf %46, %47 : vector<8x32xf32>
    %c3_40 = arith.constant 3 : index
    %c0_41 = arith.constant 0 : index
    %49 = vector.load %arg17[%c3_40, %c0_41] : memref<14x32xf32, #tpu.memory_space<vmem>>, vector<8x32xf32>
    %50 = arith.addf %49, %48 : vector<8x32xf32>
    %c3_42 = arith.constant 3 : index
    %c0_43 = arith.constant 0 : index
    %51 = vector.load %arg17[%c3_42, %c0_43] : memref<14x32xf32, #tpu.memory_space<vmem>>, vector<8x32xf32>
    tpu.vector_store %arg17[%c3_42, %c0_43], %50 {strides = array<i32>} : memref<14x32xf32, #tpu.memory_space<vmem>>, vector<8x32xf32>,
    %c0_44 = arith.constant 0 : index
    %c0_45 = arith.constant 0 : index
    %52 = vector.load %arg9[%c0_44, %c0_45] : memref<1x32xf32, #tpu.memory_space<vmem>>, vector<1x32xf32>
    %c0_46 = arith.constant 0 : index
    %c0_47 = arith.constant 0 : index
    %53 = vector.load %arg10[%c0_46, %c0_47] : memref<32x32xf32, #tpu.memory_space<vmem>>, vector<32x32xf32>
    %c0_48 = arith.constant 0 : index
    %c0_49 = arith.constant 0 : index
    %54 = vector.load %arg11[%c0_48, %c0_49] : memref<1x32xf32, #tpu.memory_space<vmem>>, vector<1x32xf32>
    %c0_50 = arith.constant 0 : index
    %c0_51 = arith.constant 0 : index
    %55 = vector.load %arg17[%c0_50, %c0_51] : memref<14x32xf32, #tpu.memory_space<vmem>>, vector<14x32xf32>
    %cst_52 = arith.constant 0.000000e+00 : f32
    %56 = vector.broadcast %cst_52 : f32 to vector<14x32xf32>
    %57 = arith.maximumf %55, %56 : vector<14x32xf32>
    %58 = vector.extract_strided_slice %57 {offsets = [0, 0], sizes = [8, 32], strides = [1, 1]} : vector<14x32xf32> to vector<8x32xf32>
    %c0_53 = arith.constant 0 : index
    %c0_54 = arith.constant 0 : index
    %c0_55 = arith.constant 0 : index
    %59 = vector.load %arg8[%c0_53, %c0_54, %c0_55] : memref<3x32x32xf32, #tpu.memory_space<vmem>>, vector<1x32x32xf32>
    %60 = vector.shape_cast %59 : vector<1x32x32xf32> to vector<32x32xf32>
    %cst_56 = arith.constant dense<0.000000e+00> : vector<8x32xf32>
    %61 = tpu.matmul %58, %60, %cst_56 {dimension_numbers = #tpu.dot_dimension_numbers<[1], [0], [0], [1], [0, 0, 1, 1], [], []>} : vector<8x32xf32>, vector<32x32xf32>, vector<8x32xf32> -> vector<8x32xf32>
    %62 = vector.extract_strided_slice %57 {offsets = [3, 0], sizes = [8, 32], strides = [1, 1]} : vector<14x32xf32> to vector<8x32xf32>
    %c1_57 = arith.constant 1 : index
    %c0_58 = arith.constant 0 : index
    %c0_59 = arith.constant 0 : index
    %63 = vector.load %arg8[%c1_57, %c0_58, %c0_59] : memref<3x32x32xf32, #tpu.memory_space<vmem>>, vector<1x32x32xf32>
    %64 = vector.shape_cast %63 : vector<1x32x32xf32> to vector<32x32xf32>
    %cst_60 = arith.constant dense<0.000000e+00> : vector<8x32xf32>
    %65 = tpu.matmul %62, %64, %cst_60 {dimension_numbers = #tpu.dot_dimension_numbers<[1], [0], [0], [1], [0, 0, 1, 1], [], []>} : vector<8x32xf32>, vector<32x32xf32>, vector<8x32xf32> -> vector<8x32xf32>
    %66 = arith.addf %61, %65 : vector<8x32xf32>
    %67 = vector.extract_strided_slice %57 {offsets = [6, 0], sizes = [8, 32], strides = [1, 1]} : vector<14x32xf32> to vector<8x32xf32>
    %c2_61 = arith.constant 2 : index
    %c0_62 = arith.constant 0 : index
    %c0_63 = arith.constant 0 : index
    %68 = vector.load %arg8[%c2_61, %c0_62, %c0_63] : memref<3x32x32xf32, #tpu.memory_space<vmem>>, vector<1x32x32xf32>
    %69 = vector.shape_cast %68 : vector<1x32x32xf32> to vector<32x32xf32>
    %cst_64 = arith.constant dense<0.000000e+00> : vector<8x32xf32>
    %70 = tpu.matmul %67, %69, %cst_64 {dimension_numbers = #tpu.dot_dimension_numbers<[1], [0], [0], [1], [0, 0, 1, 1], [], []>} : vector<8x32xf32>, vector<32x32xf32>, vector<8x32xf32> -> vector<8x32xf32>
    %71 = arith.addf %66, %70 : vector<8x32xf32>
    %72 = vector.broadcast %52 : vector<1x32xf32> to vector<8x32xf32>
    %73 = arith.addf %71, %72 : vector<8x32xf32>
    %cst_65 = arith.constant 0.000000e+00 : f32
    %74 = vector.broadcast %cst_65 : f32 to vector<8x32xf32>
    %75 = arith.maximumf %73, %74 : vector<8x32xf32>
    %cst_66 = arith.constant dense<0.000000e+00> : vector<8x32xf32>
    %76 = tpu.matmul %75, %53, %cst_66 {dimension_numbers = #tpu.dot_dimension_numbers<[1], [0], [0], [1], [0, 0, 1, 1], [], []>} : vector<8x32xf32>, vector<32x32xf32>, vector<8x32xf32> -> vector<8x32xf32>
    %77 = vector.broadcast %54 : vector<1x32xf32> to vector<8x32xf32>
    %78 = arith.addf %76, %77 : vector<8x32xf32>
    %c3_67 = arith.constant 3 : index
    %c0_68 = arith.constant 0 : index
    %79 = vector.load %arg17[%c3_67, %c0_68] : memref<14x32xf32, #tpu.memory_space<vmem>>, vector<8x32xf32>
    %80 = arith.addf %79, %78 : vector<8x32xf32>
    %c3_69 = arith.constant 3 : index
    %c0_70 = arith.constant 0 : index
    %81 = vector.load %arg17[%c3_69, %c0_70] : memref<14x32xf32, #tpu.memory_space<vmem>>, vector<8x32xf32>
    tpu.vector_store %arg17[%c3_69, %c0_70], %80 {strides = array<i32>} : memref<14x32xf32, #tpu.memory_space<vmem>>, vector<8x32xf32>,
    %c0_71 = arith.constant 0 : index
    %c0_72 = arith.constant 0 : index
    %82 = vector.load %arg12[%c0_71, %c0_72] : memref<32x64xf32, #tpu.memory_space<vmem>>, vector<32x64xf32>
    %c0_73 = arith.constant 0 : index
    %c0_74 = arith.constant 0 : index
    %83 = vector.load %arg13[%c0_73, %c0_74] : memref<32x64xf32, #tpu.memory_space<vmem>>, vector<32x64xf32>
    %c0_75 = arith.constant 0 : index
    %c0_76 = arith.constant 0 : index
    %84 = vector.load %arg14[%c0_75, %c0_76] : memref<32x64xf32, #tpu.memory_space<vmem>>, vector<32x64xf32>
    %c0_77 = arith.constant 0 : index
    %c0_78 = arith.constant 0 : index
    %85 = vector.load %arg15[%c0_77, %c0_78] : memref<1x64xf32, #tpu.memory_space<vmem>>, vector<1x64xf32>
    %c3_79 = arith.constant 3 : index
    %c0_80 = arith.constant 0 : index
    %86 = vector.load %arg17[%c3_79, %c0_80] : memref<14x32xf32, #tpu.memory_space<vmem>>, vector<8x32xf32>
    %cst_81 = arith.constant dense<0.000000e+00> : vector<8x64xf32>
    %87 = tpu.matmul %86, %82, %cst_81 {dimension_numbers = #tpu.dot_dimension_numbers<[1], [0], [0], [1], [0, 0, 1, 1], [], []>} : vector<8x32xf32>, vector<32x64xf32>, vector<8x64xf32> -> vector<8x64xf32>
    %c2_82 = arith.constant 2 : index
    %c0_83 = arith.constant 0 : index
    %88 = vector.load %arg17[%c2_82, %c0_83] : memref<14x32xf32, #tpu.memory_space<vmem>>, vector<8x32xf32>
    %cst_84 = arith.constant dense<0.000000e+00> : vector<8x64xf32>
    %89 = tpu.matmul %88, %83, %cst_84 {dimension_numbers = #tpu.dot_dimension_numbers<[1], [0], [0], [1], [0, 0, 1, 1], [], []>} : vector<8x32xf32>, vector<32x64xf32>, vector<8x64xf32> -> vector<8x64xf32>
    %90 = arith.addf %87, %89 : vector<8x64xf32>
    %c4 = arith.constant 4 : index
    %c0_85 = arith.constant 0 : index
    %91 = vector.load %arg17[%c4, %c0_85] : memref<14x32xf32, #tpu.memory_space<vmem>>, vector<8x32xf32>
    %cst_86 = arith.constant dense<0.000000e+00> : vector<8x64xf32>
    %92 = tpu.matmul %91, %84, %cst_86 {dimension_numbers = #tpu.dot_dimension_numbers<[1], [0], [0], [1], [0, 0, 1, 1], [], []>} : vector<8x32xf32>, vector<32x64xf32>, vector<8x64xf32> -> vector<8x64xf32>
    %93 = arith.addf %90, %92 : vector<8x64xf32>
    %94 = vector.broadcast %85 : vector<1x64xf32> to vector<8x64xf32>
    %95 = arith.addf %93, %94 : vector<8x64xf32>
    %c0_87 = arith.constant 0 : index
    %c0_88 = arith.constant 0 : index
    %c0_89 = arith.constant 0 : index
    %96 = vector.load %arg16[%c0_87, %c0_88, %c0_89] : memref<1x8x64xf32, #tpu.memory_space<vmem>>, vector<1x8x64xf32>
    %97 = vector.shape_cast %96 : vector<1x8x64xf32> to vector<8x64xf32>
    %98 = vector.shape_cast %95 : vector<8x64xf32> to vector<1x8x64xf32>
    tpu.vector_store %arg16[%c0_87, %c0_88, %c0_89], %98 {strides = array<i32>} : memref<1x8x64xf32, #tpu.memory_space<vmem>>, vector<1x8x64xf32>,
    return
  }
  func.func @transform_0(%arg0: i32) -> (i32, i32, i32) {
    %c0_i32 = arith.constant 0 : i32
    %c0_i32_0 = arith.constant 0 : i32
    %c0_i32_1 = arith.constant 0 : i32
    return %arg0, %c0_i32, %c0_i32_0 : i32, i32, i32
  }
  func.func @transform_1(%arg0: i32) -> (i32, i32, i32) {
    %c0_i32 = arith.constant 0 : i32
    %c0_i32_0 = arith.constant 0 : i32
    %c0_i32_1 = arith.constant 0 : i32
    %c0_i32_2 = arith.constant 0 : i32
    return %c0_i32, %c0_i32_0, %c0_i32_1 : i32, i32, i32
  }
  func.func @transform_2(%arg0: i32) -> (i32, i32) {
    %c0_i32 = arith.constant 0 : i32
    %c0_i32_0 = arith.constant 0 : i32
    %c0_i32_1 = arith.constant 0 : i32
    return %c0_i32, %c0_i32_0 : i32, i32
  }
  func.func @transform_3(%arg0: i32) -> (i32, i32, i32) {
    %c0_i32 = arith.constant 0 : i32
    %c0_i32_0 = arith.constant 0 : i32
    %c0_i32_1 = arith.constant 0 : i32
    %c0_i32_2 = arith.constant 0 : i32
    return %c0_i32, %c0_i32_0, %c0_i32_1 : i32, i32, i32
  }
  func.func @transform_4(%arg0: i32) -> (i32, i32) {
    %c0_i32 = arith.constant 0 : i32
    %c0_i32_0 = arith.constant 0 : i32
    %c0_i32_1 = arith.constant 0 : i32
    return %c0_i32, %c0_i32_0 : i32, i32
  }
  func.func @transform_5(%arg0: i32) -> (i32, i32) {
    %c0_i32 = arith.constant 0 : i32
    %c0_i32_0 = arith.constant 0 : i32
    %c0_i32_1 = arith.constant 0 : i32
    return %c0_i32, %c0_i32_0 : i32, i32
  }
  func.func @transform_6(%arg0: i32) -> (i32, i32) {
    %c0_i32 = arith.constant 0 : i32
    %c0_i32_0 = arith.constant 0 : i32
    %c0_i32_1 = arith.constant 0 : i32
    return %c0_i32, %c0_i32_0 : i32, i32
  }
  func.func @transform_7(%arg0: i32) -> (i32, i32, i32) {
    %c0_i32 = arith.constant 0 : i32
    %c0_i32_0 = arith.constant 0 : i32
    %c0_i32_1 = arith.constant 0 : i32
    %c0_i32_2 = arith.constant 0 : i32
    return %c0_i32, %c0_i32_0, %c0_i32_1 : i32, i32, i32
  }
  func.func @transform_8(%arg0: i32) -> (i32, i32) {
    %c0_i32 = arith.constant 0 : i32
    %c0_i32_0 = arith.constant 0 : i32
    %c0_i32_1 = arith.constant 0 : i32
    return %c0_i32, %c0_i32_0 : i32, i32
  }
  func.func @transform_9(%arg0: i32) -> (i32, i32) {
    %c0_i32 = arith.constant 0 : i32
    %c0_i32_0 = arith.constant 0 : i32
    %c0_i32_1 = arith.constant 0 : i32
    return %c0_i32, %c0_i32_0 : i32, i32
  }
  func.func @transform_10(%arg0: i32) -> (i32, i32) {
    %c0_i32 = arith.constant 0 : i32
    %c0_i32_0 = arith.constant 0 : i32
    %c0_i32_1 = arith.constant 0 : i32
    return %c0_i32, %c0_i32_0 : i32, i32
  }
  func.func @transform_11(%arg0: i32) -> (i32, i32) {
    %c0_i32 = arith.constant 0 : i32
    %c0_i32_0 = arith.constant 0 : i32
    %c0_i32_1 = arith.constant 0 : i32
    return %c0_i32, %c0_i32_0 : i32, i32
  }
  func.func @transform_12(%arg0: i32) -> (i32, i32) {
    %c0_i32 = arith.constant 0 : i32
    %c0_i32_0 = arith.constant 0 : i32
    %c0_i32_1 = arith.constant 0 : i32
    return %c0_i32, %c0_i32_0 : i32, i32
  }
  func.func @transform_13(%arg0: i32) -> (i32, i32) {
    %c0_i32 = arith.constant 0 : i32
    %c0_i32_0 = arith.constant 0 : i32
    %c0_i32_1 = arith.constant 0 : i32
    return %c0_i32, %c0_i32_0 : i32, i32
  }
  func.func @transform_14(%arg0: i32) -> (i32, i32) {
    %c0_i32 = arith.constant 0 : i32
    %c0_i32_0 = arith.constant 0 : i32
    %c0_i32_1 = arith.constant 0 : i32
    return %c0_i32, %c0_i32_0 : i32, i32
  }
  func.func @transform_15(%arg0: i32) -> (i32, i32, i32) {
    %c0_i32 = arith.constant 0 : i32
    %c0_i32_0 = arith.constant 0 : i32
    %c0_i32_1 = arith.constant 0 : i32
    return %arg0, %c0_i32, %c0_i32_0 : i32, i32, i32
  }
}

</mosaic_0001>

<bundles_post_ra>
// kernel: tpu_custom_call.1
= control target key start
LH: loop header
LB: loop body
LE: loop exit
PB: predicated region body
PF: predicated region fallthrough
CT: control target
= control target key end

     0   :  { %s3288_s0 = inlined_call_operand.vmem [shape: f32[2,10,8], index: 0, kind: input, shape index: {}]   ;;  %s3289_s1 = inlined_call_operand.hbm [shape: f32[3,8,32], index: 1, kind: input, shape index: {}]   ;;  %s3290_s2 = inlined_call_operand.vmem [shape: f32[1,32], index: 2, kind: input, shape index: {}]   ;;  %s3291_s3 = inlined_call_operand.hbm [shape: f32[3,32,32], index: 3, kind: input, shape index: {}]   ;;  %s3292_s4 = inlined_call_operand.hbm [shape: f32[1,32], index: 4, kind: input, shape index: {}]   ;;  %s3293_s5 = inlined_call_operand.vmem [shape: f32[32,32], index: 5, kind: input, shape index: {}]   ;;  %s3294_s6 = inlined_call_operand.hbm [shape: f32[1,32], index: 6, kind: input, shape index: {}]   ;;  %s3295_s7 = inlined_call_operand.hbm [shape: f32[3,32,32], index: 7, kind: input, shape index: {}]   ;;  %s3296_s8 = inlined_call_operand.hbm [shape: f32[1,32], index: 8, kind: input, shape index: {}]   ;;  %s3297_s9 = inlined_call_operand.vmem [shape: f32[32,32], index: 9, kind: input, shape index: {}]   ;;  %s3298_s10 = inlined_call_operand.hbm [shape: f32[1,32], index: 10, kind: input, shape index: {}]   ;;  %s3299_s11 = inlined_call_operand.hbm [shape: f32[32,64], index: 11, kind: input, shape index: {}]   ;;  %s3300_s12 = inlined_call_operand.hbm [shape: f32[32,64], index: 12, kind: input, shape index: {}]   ;;  %s3301_s13 = inlined_call_operand.vmem [shape: f32[32,64], index: 13, kind: input, shape index: {}]   ;;  %s3302_s14 = inlined_call_operand.vmem [shape: f32[1,64], index: 14, kind: input, shape index: {}]   ;;  %s3303_s15 = inlined_call_operand.hbm [shape: f32[2,8,64], index: 15, kind: output, shape index: {}]  }
   0x1   :  { %3320 = sst [smem:[#allocation33_spill]] %s3291_s3 }
   0x2   :  { %3321 = sst [smem:[#allocation34_spill]] %s3301_s13 }
   0x3   :  { %3322 = sst [smem:[#allocation35_spill]] %s3302_s14 }
   0x4   :  { %3323 = sst [smem:[#allocation36_spill]] %s3303_s15 }
   0x5   :  { %20 = vsyncpa [#allocation4], 0 }
   0x6   :  { %21 = vsyncpa [#allocation7], 0 }
   0x7   :  { %22 = vsyncpa [#allocation10], 0 }
   0x8   :  { %23 = vsyncpa [#allocation13], 0 }
   0x9   :  { %24 = vsyncpa [#allocation16], 0 }
   0xa   :  { %25 = vsyncpa [#allocation5], 0 }
   0xb   :  { %27 = vsyncpa [#allocation5 + $0x1], 0  ;;  %s2833_s18 = smov 0   ;;  %s2835_s19 = smov 0  }
   0xc   :  { %s2837_s20 = smov 0   ;;  %s2839_s21 = smov 0  }
   0xd LB: > { %3324 = sst [smem:[#allocation25_spill]] %s2724_s18  ;;  %s2854_s22 = sadd.s32 4294967295, %s2736_s21   ;;  %s2736_s21 = sphi %s2839_s21, %s3360_s21   ;;  %s2732_s20 = sphi %s2837_s20, %s3363_s20   ;;  %s2728_s19 = sphi %s2835_s19, %s3362_s19   ;;  %s2724_s18 = sphi %s2833_s18, %s3361_s18  }
   0xe   : > { %3325 = sst [smem:[#allocation26_spill]] %s2728_s19  ;;  %s1954_s23 = sadd.s32 4294967294, %s2736_s21  }
   0xf   : > { %3326 = sst [smem:[#allocation27_spill]] %s2732_s20  ;;  %s2858_s24 = sadd.s32 1, %s2736_s21  }
  0x10   : > { %3327 = sst [smem:[#allocation28_spill]] %s2736_s21  ;;  %s360_s25 = sadd.s32 1, %s2732_s20 }
  0x11   : > { %3328 = sst [smem:[#allocation29_spill]] %s2858_s24  ;;  %s357_s26 = ssub.s32 %s2736_s21, %s2858_s24 }
  0x12   : > { %p370_p0 = scmp.ne.s32.totalorder %s2732_s20, %s2728_s19  ;;  %p358_p1 = scmp.eq.s32.totalorder %s357_s26, 0 }
  0x13   : > { %p371_p2 = scmp.eq.s32.totalorder %s2854_s22, 1  ;;  %p376_p3 = scmp.ne.s32.totalorder %s2728_s19, %s2724_s18 }
  0x14   : > { %p377_p4 = scmp.eq.s32.totalorder %s1954_s23, 1  ;;  %p1955_p7 = scmp.ge.s32.totalorder %s2736_s21, 1 }
  0x15   : > { %s2869_s27 = scalar_select %p358_p1, %s2732_s20, %s360_s25  }
  0x16   : > { %p2871_p5 = por %p371_p2, %p370_p0  ;;  %p2875_p6 = por %p377_p4, %p376_p3 }
  0x17   : > { %3329 = sst [smem:[#allocation30_spill]] %s2869_s27  ;;  %p384_p8 = scmp.lt.s32.totalorder %s2736_s21, 3 }
  0x18   : > { %s3330_s28 = scalar_select %p2871_p5, 1, 0 }
  0x19   : > { %s3332_s29 = scalar_select %p2875_p6, 1, 0 }
  0x1a   : > { %3331 = sst [smem:[#allocation31_spill]] %s3330_s28  ;;  %p3311_p9 = scmp.eq.s32.totalorder %s2854_s22, 0 }
  0x1b   : > { %3333 = sst [smem:[#allocation32_spill]] %s3332_s29  ;;  %p2882_p10 = pnand %p1955_p7, %p384_p8 }
  0x1c   : > { %s2738_s16 = smov [#allocation6]   ;;  %s2739_s25 = smov [#allocation9]  }
  0x1d   : > { %s3334_s30 = scalar_select %p2882_p10, 1, 0 }
  0x1e   : > { %p2305_p11 = pneg %p2882_p10  ;;  %s412_s17 = sshll.u32 %s2738_s16, 4  ;;  %s2888_s17 = int_to_ptr.vmem [resolvable:$true] %s412_s17 }
  0x1f   : > { %s440_s26 = sshll.u32 %s2739_s25, 4  ;;  %s2740_s27 = smov [#allocation12]   ;;  %s2896_s26 = int_to_ptr.vmem [resolvable:$true] %s440_s26 }
  0x20   : > { %p2892_p12 = pnand %p3311_p9, %p2305_p11  ;;  %s2898_s20 = sshll.u32 %s2740_s27, 4  ;;  %s465_s20 = int_to_ptr.vmem [resolvable:$true] %s2898_s20 }
  0x21   : > { %s3336_s3 = sld [smem:[#allocation33_spill]] }
  0x22   : > { %p2908_p0 = pneg %p2892_p12 }
  0x27   : > { %s2402_s18 = scalar_lea.hbm %s3336_s3, 1536 }
  0x28   : > { %p2403_p13 = scmp.ne.s32.totalorder %s3336_s3, %s2402_s18  ;;  %p2409_p3 = scmp.lt.u32.totalorder %s2402_s18, %s3336_s3 }
  0x2a   : > { %p2405_p1 = pnand %p2908_p0, %p2403_p13 }
  0x2c   : > { %p2406_p2 = pneg %p2405_p1 }
  0x2e   : > { %p2411_p4 = pnand %p2409_p3, %p2406_p2 }
  0x30   : > { %2414 = shalt.err (!%p2411_p4)
}
  0x31   : > { %s2415_s21 = scalar_lea.vmem %s2888_s17, 1536  ;;  %p2423_p9 = scmp.lt.s32.totalorder %s2888_s17, %s2888_s17 }
  0x32   : > { %p2416_p7 = scmp.ne.s32.totalorder %s2888_s17, %s2415_s21  ;;  %p2424_p6 = scmp.lt.s32.totalorder %s2415_s21, %s2415_s21 }
  0x34   : > { %p2418_p8 = pnand %p2416_p7, %p2908_p0  ;;  %p2425_p13 = por %p2424_p6, %p2423_p9 }
  0x36   : > { %p2419_p11 = pneg %p2418_p8 }
  0x38   : > { %p2426_p1 = pnand %p2425_p13, %p2419_p11 }
  0x3a   : > { %2429 = shalt.err (!%p2426_p1)
}
  0x3b   : > { %s3318_s24 = smov 128   ;;  %s2742_s18 = smov 8  }
  0x3c   : > { %2311 = dma.hbm_to_vmem [thread:$0]  (!%p2892_p12), %s3336_s3, 1536, %s2888_s17, [#allocation7], %s3318_s24, %s3318_s24, %s2742_s18  }
  0x3d   : > { %s2430_s21 = scalar_lea.hbm %s3294_s6, 16 }
  0x3e   : > { %p2431_p6 = scmp.ne.s32.totalorder %s3294_s6, %s2430_s21  ;;  %p2437_p3 = scmp.lt.u32.totalorder %s2430_s21, %s3294_s6 }
  0x40   : > { %p2433_p9 = pnand %p2431_p6, %p2908_p0 }
  0x42   : > { %p2434_p2 = pneg %p2433_p9 }
  0x44   : > { %p2439_p4 = pnand %p2437_p3, %p2434_p2 }
  0x46   : > { %2442 = shalt.err (!%p2439_p4)
}
  0x47   : > { %s2443_s17 = scalar_lea.vmem %s2896_s26, 16  ;;  %s2450_s14 = scalar_lea.vmem %s2896_s26, 32 }
  0x48   : > { %p2444_p7 = scmp.ne.s32.totalorder %s2896_s26, %s2443_s17  ;;  %p2451_p13 = scmp.lt.s32.totalorder %s2896_s26, %s2896_s26 }
  0x49   : > { %p2452_p1 = scmp.lt.s32.totalorder %s2450_s14, %s2443_s17 }
  0x4a   : > { %p2446_p8 = pnand %p2444_p7, %p2908_p0 }
  0x4b   : > { %p2453_p6 = por %p2452_p1, %p2451_p13 }
  0x4c   : > { %p2447_p11 = pneg %p2446_p8 }
  0x4e   : > { %p2454_p9 = pnand %p2453_p6, %p2447_p11 }
  0x50   : > { %2457 = shalt.err (!%p2454_p9)
}
  0x51   : > { %2317 = dma.hbm_to_vmem [thread:$0]  (!%p2892_p12), %s3294_s6, 16, %s2896_s26, [#allocation10]  }
  0x52   : > { %s2458_s16 = scalar_lea.hbm %s3296_s8, 16 }
  0x53   : > { %p2459_p2 = scmp.ne.s32.totalorder %s3296_s8, %s2458_s16  ;;  %p2465_p7 = scmp.lt.u32.totalorder %s2458_s16, %s3296_s8 }
  0x55   : > { %p2461_p3 = pnand %p2459_p2, %p2908_p0 }
  0x57   : > { %p2462_p4 = pneg %p2461_p3 }
  0x59   : > { %p2467_p8 = pnand %p2465_p7, %p2462_p4 }
  0x5b   : > { %2470 = shalt.err (!%p2467_p8)
}
  0x5c   : > { %s2471_s14 = scalar_lea.vmem %s465_s20, 16  ;;  %s2478_s26 = scalar_lea.vmem %s465_s20, 32 }
  0x5d   : > { %p2472_p11 = scmp.ne.s32.totalorder %s465_s20, %s2471_s14  ;;  %p2479_p6 = scmp.lt.s32.totalorder %s465_s20, %s465_s20 }
  0x5e   : > { %p2480_p9 = scmp.lt.s32.totalorder %s2478_s26, %s2471_s14 }
  0x5f   : > { %p2474_p13 = pnand %p2472_p11, %p2908_p0 }
  0x60   : > { %p2481_p5 = por %p2480_p9, %p2479_p6 }
  0x61   : > { %p2475_p1 = pneg %p2474_p13 }
  0x63   : > { %p2482_p10 = pnand %p2481_p5, %p2475_p1 }
  0x65   : > { %2485 = shalt.err (!%p2482_p10)
}
  0x66   : > { %2323 = dma.hbm_to_vmem [thread:$0]  (!%p2892_p12), %s3296_s8, 16, %s465_s20, [#allocation13]  }
  0x67   : > { %s2743_s28 = smov [#allocation15]   ;;  %s2744_s16 = smov [#allocation3]  }
  0x68   : > { %s488_s29 = sshll.u32 %s2743_s28, 4  ;;  %s396_s25 = sshll.u32 %s2744_s16, 4  ;;  %s489_s29 = int_to_ptr.vmem [resolvable:$true] %s488_s29  ;;  %s397_s25 = int_to_ptr.vmem [resolvable:$true] %s396_s25 }
  0x69   : > { %s2486_s17 = scalar_lea.hbm %s3299_s11, 512 }
  0x6a   : > { %p2487_p5 = scmp.ne.s32.totalorder %s3299_s11, %s2486_s17  ;;  %p2493_p3 = scmp.lt.u32.totalorder %s2486_s17, %s3299_s11 }
  0x6c   : > { %p2489_p10 = pnand %p2487_p5, %p2908_p0 }
  0x6e   : > { %p2490_p2 = pneg %p2489_p10 }
  0x70   : > { %p2495_p4 = pnand %p2493_p3, %p2490_p2 }
  0x72   : > { %2498 = shalt.err (!%p2495_p4)
}
  0x73   : > { %s2499_s20 = scalar_lea.vmem %s489_s29, 512  ;;  %p2507_p13 = scmp.lt.s32.totalorder %s489_s29, %s489_s29 }
  0x74   : > { %p2500_p7 = scmp.ne.s32.totalorder %s489_s29, %s2499_s20  ;;  %p2508_p1 = scmp.lt.s32.totalorder %s2499_s20, %s2499_s20 }
  0x76   : > { %p2502_p8 = pnand %p2500_p7, %p2908_p0  ;;  %p2509_p6 = por %p2508_p1, %p2507_p13 }
  0x78   : > { %p2503_p11 = pneg %p2502_p8 }
  0x7a   : > { %p2510_p9 = pnand %p2509_p6, %p2503_p11 }
  0x7c   : > { %2513 = shalt.err (!%p2510_p9)
}
  0x7d   : > { %s3338_s19 = smov 128   ;;  %s2514_s21 = scalar_lea.hbm %s3289_s1, 384 }
  0x7e   : > { %2329 = dma.hbm_to_vmem [thread:$0]  (!%p2892_p12), %s3299_s11, 512, %s489_s29, [#allocation16], %s3338_s19, %s3338_s19, %s2742_s18  }
  0x7f   : > { %p2515_p5 = scmp.ne.s32.totalorder %s3289_s1, %s2514_s21  ;;  %p2521_p3 = scmp.lt.u32.totalorder %s2514_s21, %s3289_s1 }
  0x81   : > { %p2517_p10 = pnand %p2515_p5, %p2908_p0 }
  0x83   : > { %p2518_p2 = pneg %p2517_p10 }
  0x85   : > { %p2523_p4 = pnand %p2521_p3, %p2518_p2 }
  0x87   : > { %2526 = shalt.err (!%p2523_p4)
}
  0x88   : > { %s2527_s20 = scalar_lea.vmem %s397_s25, 384  ;;  %p2535_p13 = scmp.lt.s32.totalorder %s397_s25, %s397_s25 }
  0x89   : > { %p2528_p7 = scmp.ne.s32.totalorder %s397_s25, %s2527_s20  ;;  %p2536_p1 = scmp.lt.s32.totalorder %s2527_s20, %s2527_s20 }
  0x8b   : > { %p2530_p8 = pnand %p2528_p7, %p2908_p0  ;;  %p2537_p6 = por %p2536_p1, %p2535_p13 }
  0x8d   : > { %p2531_p11 = pneg %p2530_p8 }
  0x8f   : > { %p2538_p9 = pnand %p2537_p6, %p2531_p11 }
  0x91   : > { %2541 = shalt.err (!%p2538_p9)
}
  0x92   : > { %2308 = dma.hbm_to_vmem [thread:$0]  (!%p2892_p12), %s3289_s1, 384, %s397_s25, [#allocation4], %s3338_s19, %s3338_s19, %s2742_s18  }
  0x93   : > { %s2745_s28 = smov [#allocation8]   ;;  %s2746_s27 = smov [#allocation11]  }
  0x94   : > { %s426_s16 = sshll.u32 %s2745_s28, 4  ;;  %s450_s21 = sshll.u32 %s2746_s27, 4  ;;  %s427_s16 = int_to_ptr.vmem [resolvable:$true] %s426_s16  ;;  %s451_s21 = int_to_ptr.vmem [resolvable:$true] %s450_s21 }
  0x95   : > { %s2542_s26 = scalar_lea.hbm %s3292_s4, 16 }
  0x96   : > { %p2543_p5 = scmp.ne.s32.totalorder %s3292_s4, %s2542_s26  ;;  %p2549_p3 = scmp.lt.u32.totalorder %s2542_s26, %s3292_s4 }
  0x98   : > { %p2545_p10 = pnand %p2543_p5, %p2908_p0 }
  0x9a   : > { %p2546_p2 = pneg %p2545_p10 }
  0x9c   : > { %p2551_p4 = pnand %p2549_p3, %p2546_p2 }
  0x9e   : > { %2554 = shalt.err (!%p2551_p4)
}
  0x9f   : > { %s2555_s25 = scalar_lea.vmem %s427_s16, 16  ;;  %s2562_s24 = scalar_lea.vmem %s427_s16, 32 }
  0xa0   : > { %p2556_p7 = scmp.ne.s32.totalorder %s427_s16, %s2555_s25  ;;  %p2563_p13 = scmp.lt.s32.totalorder %s427_s16, %s427_s16 }
  0xa1   : > { %p2564_p1 = scmp.lt.s32.totalorder %s2562_s24, %s2555_s25 }
  0xa2   : > { %p2558_p8 = pnand %p2556_p7, %p2908_p0 }
  0xa3   : > { %p2565_p6 = por %p2564_p1, %p2563_p13 }
  0xa4   : > { %p2559_p11 = pneg %p2558_p8 }
  0xa6   : > { %p2566_p9 = pnand %p2565_p6, %p2559_p11 }
  0xa8   : > { %2569 = shalt.err (!%p2566_p9)
}
  0xa9   : > { %2314 = dma.hbm_to_vmem [thread:$0]  (!%p2892_p12), %s3292_s4, 16, %s427_s16, [#allocation7]  }
  0xaa   : > { %s2570_s14 = scalar_lea.hbm %s3295_s7, 1536 }
  0xab   : > { %p2571_p5 = scmp.ne.s32.totalorder %s3295_s7, %s2570_s14  ;;  %p2577_p3 = scmp.lt.u32.totalorder %s2570_s14, %s3295_s7 }
  0xad   : > { %p2573_p10 = pnand %p2571_p5, %p2908_p0 }
  0xaf   : > { %p2574_p2 = pneg %p2573_p10 }
  0xb1   : > { %p2579_p4 = pnand %p2577_p3, %p2574_p2 }
  0xb3   : > { %2582 = shalt.err (!%p2579_p4)
}
  0xb4   : > { %s2583_s25 = scalar_lea.vmem %s451_s21, 1536  ;;  %p2591_p13 = scmp.lt.s32.totalorder %s451_s21, %s451_s21 }
  0xb5   : > { %p2584_p7 = scmp.ne.s32.totalorder %s451_s21, %s2583_s25  ;;  %p2592_p1 = scmp.lt.s32.totalorder %s2583_s25, %s2583_s25 }
  0xb7   : > { %p2586_p8 = pnand %p2584_p7, %p2908_p0  ;;  %p2593_p6 = por %p2592_p1, %p2591_p13 }
  0xb9   : > { %p2587_p11 = pneg %p2586_p8 }
  0xbb   : > { %p2594_p9 = pnand %p2593_p6, %p2587_p11 }
  0xbd   : > { %2597 = shalt.err (!%p2594_p9)
}
  0xbe   : > { %2320 = dma.hbm_to_vmem [thread:$0]  (!%p2892_p12), %s3295_s7, 1536, %s451_s21, [#allocation10], %s3338_s19, %s3338_s19, %s2742_s18  }
  0xbf   : > { %s2747_s28 = smov [#allocation14]   ;;  %s2748_s3 = smov [#allocation17]  }
  0xc0   : > { %s478_s27 = sshll.u32 %s2747_s28, 4  ;;  %s501_s17 = sshll.u32 %s2748_s3, 4  ;;  %s479_s27 = int_to_ptr.vmem [resolvable:$true] %s478_s27  ;;  %s502_s17 = int_to_ptr.vmem [resolvable:$true] %s501_s17 }
  0xc1   : > { %s2598_s13 = scalar_lea.hbm %s3298_s10, 16 }
  0xc2   : > { %p2599_p5 = scmp.ne.s32.totalorder %s3298_s10, %s2598_s13  ;;  %p2605_p3 = scmp.lt.u32.totalorder %s2598_s13, %s3298_s10 }
  0xc4   : > { %p2601_p10 = pnand %p2599_p5, %p2908_p0 }
  0xc6   : > { %p2602_p2 = pneg %p2601_p10 }
  0xc8   : > { %p2607_p4 = pnand %p2605_p3, %p2602_p2 }
  0xca   : > { %2610 = shalt.err (!%p2607_p4)
}
  0xcb   : > { %s2611_s21 = scalar_lea.vmem %s479_s27, 16  ;;  %s2618_s24 = scalar_lea.vmem %s479_s27, 32 }
  0xcc   : > { %p2612_p7 = scmp.ne.s32.totalorder %s479_s27, %s2611_s21  ;;  %p2619_p13 = scmp.lt.s32.totalorder %s479_s27, %s479_s27 }
  0xcd   : > { %p2620_p1 = scmp.lt.s32.totalorder %s2618_s24, %s2611_s21 }
  0xce   : > { %p2614_p8 = pnand %p2612_p7, %p2908_p0 }
  0xcf   : > { %p2621_p6 = por %p2620_p1, %p2619_p13 }
  0xd0   : > { %p2615_p11 = pneg %p2614_p8 }
  0xd2   : > { %p2622_p9 = pnand %p2621_p6, %p2615_p11 }
  0xd4   : > { %2625 = shalt.err (!%p2622_p9)
}
  0xd5   : > { %2326 = dma.hbm_to_vmem [thread:$0]  (!%p2892_p12), %s3298_s10, 16, %s479_s27, [#allocation13]  }
  0xd6   : > { %s2626_s13 = scalar_lea.hbm %s3300_s12, 512 }
  0xd7   : > { %p2627_p5 = scmp.ne.s32.totalorder %s3300_s12, %s2626_s13  ;;  %p2633_p3 = scmp.lt.u32.totalorder %s2626_s13, %s3300_s12 }
  0xd9   : > { %p2629_p10 = pnand %p2627_p5, %p2908_p0 }
  0xdb   : > { %p2630_p2 = pneg %p2629_p10 }
  0xdd   : > { %p2635_p4 = pnand %p2633_p3, %p2630_p2 }
  0xdf   : > { %2638 = shalt.err (!%p2635_p4)
}
  0xe0   : > { %s2639_s21 = scalar_lea.vmem %s502_s17, 512  ;;  %p2647_p13 = scmp.lt.s32.totalorder %s502_s17, %s502_s17 }
  0xe1   : > { %p2640_p7 = scmp.ne.s32.totalorder %s502_s17, %s2639_s21  ;;  %p2648_p1 = scmp.lt.s32.totalorder %s2639_s21, %s2639_s21 }
  0xe3   : > { %p2642_p8 = pnand %p2640_p7, %p2908_p0  ;;  %p2649_p6 = por %p2648_p1, %p2647_p13 }
  0xe5   : > { %p2643_p11 = pneg %p2642_p8 }
  0xe7   : > { %p2650_p9 = pnand %p2649_p6, %p2643_p11 }
  0xe9   : > { %2653 = shalt.err (!%p2650_p9)
}
  0xea   : > { %2332 = dma.hbm_to_vmem [thread:$0]  (!%p2892_p12), %s3300_s12, 512, %s502_s17, [#allocation16], %s3338_s19, %s3338_s19, %s2742_s18  }
  0xeb   : > { %p3339_p5 = scmp.ne.s32.totalorder %s3334_s30, 0 }
  0xec   : > { %p3340_p0 = scmp.eq.s32.totalorder (!%p3339_p5), %s2854_s22, 0 }
  0xed   : > { %531 = sbr.rel (%p3339_p5) target bundleno = 1643 (0x66b), region = 80 }
  0xf4   : > { %2699 = dma.done.wait (%p3340_p0), [#allocation4], 384   ;;  %p3341_p10 = pmov %p3340_p0 }
  0xf5   : > { %p3342_p2 = pmov %p3340_p0 }
  0xf6   : > { %2701 = vsyncadd (%p3341_p10), [#allocation4], 4294966912 }
  0xf7   : > { %2703 = dma.done.wait (%p3342_p2), [#allocation7], 1552   ;;  %p3343_p3 = pmov %p3340_p0 }
  0xf8   : > { %p3344_p4 = pmov %p3340_p0 }
  0xf9   : > { %2705 = vsyncadd (%p3343_p3), [#allocation7], 4294965744 }
  0xfa   : > { %2707 = dma.done.wait (%p3344_p4), [#allocation10], 1552   ;;  %p3345_p12 = pmov %p3340_p0 }
  0xfb   : > { %p3346_p7 = pmov %p3340_p0 }
  0xfc   : > { %2709 = vsyncadd (%p3345_p12), [#allocation10], 4294965744 }
  0xfd   : > { %2711 = dma.done.wait (%p3346_p7), [#allocation13], 32   ;;  %p3347_p8 = pmov %p3340_p0 }
  0xfe   : > { %p3348_p11 = pmov %p3340_p0 }
  0xff   : > { %2713 = vsyncadd (%p3347_p8), [#allocation13], 4294967264 }
 0x100   : > { %2715 = dma.done.wait (%p3348_p11), [#allocation16], 1024   ;;  %p3349_p13 = pmov %p3340_p0 }
 0x101   : > { %p611_p1 = scmp.lt.s32.totalorder %s2854_s22, 1  ;;  %v2749_v0 = vmov 0.0   ;;  %vm2750_vm0 = vmmov 0   ;;  %vm628_vm1 = vcmask 64512   ;;  %v621_v1 = vld [vmem:[#allocation3 + $0x8] sm:$0xff]  ;;  %v619_v2 = vld [vmem:[#allocation3] sm:$0xff] }
 0x102   : > { %2717 = vsyncadd (%p3349_p13), [#allocation16], 4294966272  ;;  %2065 = vmatprep.subr.mxu0 %v2749_v0  ;;  %2070 = vmatprep.subr.mxu1 %v2749_v0  ;;  %vm624_vm2 = vcmask 1046528   ;;  %v774_v9 = vld [vmem:[#allocation3 + $0x10] sm:$0xff]  ;;  %vm775_vm3 = vcmask 1045504   ;;  %vm859_vm4 = vcmask 261120  }
 0x103   : > { %2067 = vmatprep.mubr.msk.f32.mxu0 %vm2750_vm0, %v2749_v0  ;;  %2072 = vmatprep.mubr.msk.f32.mxu1 %vm2750_vm0, %v2749_v0  ;;  %s612_s15 = scalar_select %p611_p1, %s2854_s22, 1  ;;  %vm861_vm5 = vcmask 259072   ;;  %860 = vst.msk [vmem:[#allocation2] sm:$0xff] %vm859_vm4, %v2749_v0  ;;  %v879_v12 = vld [vmem:[#allocation6 + $0x20] sm:$0xff]  ;;  %v880_v13 = vld [vmem:[#allocation6 + $0x28] sm:$0xff]  ;;  %v2751_v15 = vmov 0.0|0.0  }
 0x104   : > { %2066 = vmatpush3.msra.mxu0 %v621_v1  ;;  %2071 = vmatpush3.msra.mxu1 %v619_v2  ;;  %862 = vst.msk [vmem:[#allocation2 + $0x8] sm:$0x3f] %vm861_vm5, %v2749_v0  ;;  %v874_v14 = vld [vmem:[#allocation6] sm:$0xff]  ;;  %v2202_v16 = vpack.c.bf16 %v880_v13, %v879_v12  ;;  %v875_v17 = vld [vmem:[#allocation6 + $0x8] sm:$0xff]  ;;  %v881_v18 = vld [vmem:[#allocation6 + $0x30] sm:$0xff]  ;;  %vm885_vm6 = vcmask 1044480  }
 0x105   : > { %s2003_s30 = sshll.u32 %s612_s15, 4  ;;  %2075 = vmatprep.subr.mxu0 %v2749_v0  ;;  %2201 = vmatprep.subr.bf16.mxu1 %v2751_v15  ;;  %v882_v19 = vld [vmem:[#allocation6 + $0x38] sm:$0xff]  ;;  %v2208_v20 = vpack.c.bf16 %v875_v17, %v874_v14  ;;  %v876_v21 = vld [vmem:[#allocation6 + $0x10] sm:$0xff]  ;;  %v1037_v35 = vld [vmem:[#allocation6 + $0x40] sm:$0xff]  ;;  %vm1041_vm7 = vcmask 1043456   ;;  %vm1381_vm8 = vcmask 1041408  }
 0x106   : > { %s615_s19 = scalar_lea.vmem %s3288_s0, %s2003_s30  ;;  %v877_v22 = vld [vmem:[#allocation6 + $0x18] sm:$0xff]  ;;  %v2205_v23 = vpack.c.bf16 %v882_v19, %v881_v18  ;;  %v1038_v36 = vld [vmem:[#allocation6 + $0x48] sm:$0xff]  ;;  %v1039_v46 = vld [vmem:[#allocation6 + $0x50] sm:$0xff]  ;;  %s3350_s3 = sld [smem:[#allocation34_spill]]  ;;  %vm1791_vm9 = vcmask 523264  }
 0x107   : > { %v617_v3 = vld [vmem:[%s615_s19] sm:$0xff]  ;;  %v618_v4 = vld [vmem:[%s615_s19 + $0x8] sm:$0x3]  ;;  %v2211_v24 = vpack.c.bf16 %v877_v22, %v876_v21  ;;  %v2214_v41 = vpack.c.bf16 %v1038_v36, %v1037_v35  ;;  %v867_v57 = vld [vmem:[%s3293_s5 + $0x10] sm:$0xff]  ;;  %s3351_s13 = sld [smem:[#allocation26_spill]]  ;;  %s3352_s30 = sld [smem:[#allocation35_spill]] }
 0x108   : > { %v625_v5 = vrot.slane %v617_v3, 1  ;;  %v626_v6 = vrot.slane %v618_v4, 1  ;;  %v777_v7 = vrot.slane %v618_v4, 2  ;;  %2073 = vmatmul.mubr.msk.f32.vlgmr.msra.gmra.mrb[0].mxu1 %vm628_vm1, %v617_v3  ;;  %v776_v8 = vrot.slane %v617_v3, 2  ;;  %v1982_v30 = vld [vmem:[%s3290_s2] ss:$0 sm:$0xff] }
 0x109   : > { %2088 = vmatprep.mubr.msk.f32.mxu1 %vm2750_vm0, %v2749_v0  ;;  %2203 = vmatpush3.bf16.msra.mxu1 %v2202_v16  ;;  %v1040_v47 = vld [vmem:[#allocation6 + $0x58] sm:$0xff]  ;;  %v866_v55 = vld [vmem:[%s3293_s5 + $0x8] sm:$0xff]  ;;  %v868_v58 = vld [vmem:[%s3293_s5 + $0x18] sm:$0xff]  ;;  %s3353_s23 = sld [smem:[#allocation31_spill]]  ;;  %s2000_s18 = sshll.u32 %s2854_s22, 7 }
 0x10a   : > { %v627_v10 = vsel %vm624_vm2, %v625_v5, %v626_v6  ;;  %v778_v11 = vsel %vm775_vm3, %v776_v8, %v777_v7  ;;  %2204 = vmatprep.subr.bf16.mxu1 %v2751_v15  ;;  %v2217_v50 = vpack.c.bf16 %v1040_v47, %v1039_v46  ;;  %v865_v54 = vld [vmem:[%s3293_s5] sm:$0xff]  ;;  %v2223_v59 = vpack.c.bf16 %v868_v58, %v867_v57  ;;  %v1986_v2 = vld [vmem:[#allocation8] ss:$0 sm:$0xff]  ;;  %v1218_v8 = vld [vmem:[#allocation11] sm:$0xff]  ;;  %s3354_s26 = sld [smem:[#allocation36_spill]]  ;;  %s2752_s22 = smov [#allocation18]  }
 0x10b   : > { %2068 = vmatmul.mubr.msk.f32.vlgmr.msra.gmra.mrb[0].mxu0 %vm628_vm1, %v627_v10  ;;  %v2220_v56 = vpack.c.bf16 %v866_v55, %v865_v54  ;;  %v1223_v10 = vld [vmem:[#allocation11 + $0x20] sm:$0xff]  ;;  %v1224_v12 = vld [vmem:[#allocation11 + $0x28] sm:$0xff]  ;;  %v1220_v13 = vld [vmem:[#allocation11 + $0x10] sm:$0xff]  ;;  %s2658_s25 = sshll.u32 %s2752_s22, 4  ;;  %s2659_s25 = int_to_ptr.vmem [resolvable:$false] %s2658_s25 }
 0x10c   : > { %2076 = vmatpush3.msra.mxu0 %v774_v9  ;;  %2077 = vmatprep.mubr.msk.f32.mxu0 %vm2750_vm0, %v2749_v0  ;;  %v1219_v9 = vld [vmem:[#allocation11 + $0x8] sm:$0xff]  ;;  %v1221_v14 = vld [vmem:[#allocation11 + $0x18] sm:$0xff]  ;;  %v2226_v16 = vpack.c.bf16 %v1224_v12, %v1223_v10  ;;  %v1225_v17 = vld [vmem:[#allocation11 + $0x30] sm:$0xff]  ;;  %s2660_s16 = scalar_lea.vmem %s2659_s25, 256 }
 0x10d   : > { %2207 = vmatprep.subr.bf16.mxu0 %v2751_v15  ;;  %2206 = vmatpush3.bf16.msra.mxu1 %v2205_v23  ;;  %v1226_v18 = vld [vmem:[#allocation11 + $0x38] sm:$0xff]  ;;  %v2235_v19 = vpack.c.bf16 %v1221_v14, %v1220_v13  ;;  %v1379_v36 = vld [vmem:[#allocation11 + $0x50] sm:$0xff]  ;;  %v1211_v46 = vld [vmem:[%s3297_s9 + $0x10] sm:$0xff]  ;;  %s608_s21 = sand.u32 1, %s3351_s13  }
 0x10e   : > { %2213 = vmatprep.subr.bf16.mxu1 %v2751_v15  ;;  %v1987_v21 = vld [vmem:[#allocation9] ss:$0 sm:$0xff]  ;;  %v1212_v47 = vld [vmem:[%s3297_s9 + $0x18] sm:$0xff]  ;;  %v1992_v54 = vld [vmem:[#allocation12] ss:$0 sm:$0xff]  ;;  %s1976_s27 = sshll.u32 %s608_s21, 3 }
 0x10f   : > { %2078 = vmatmul.mubr.msk.f32.vlgmr.msra.gmra.mrb[2].mxu0 %vm628_vm1, %v778_v11  ;;  %v2232_v11 = vpack.c.bf16 %v1219_v9, %v1218_v8  ;;  %v1993_v9 = vld [vmem:[#allocation14] ss:$0 sm:$0xff]  ;;  %s610_s19 = scalar_lea.vmem [#allocation18], %s1976_s27  ;;  %s1794_s20 = scalar_lea.sflag [#allocation5], %s608_s21 }
 0x110   : > { %2099 = vmatprep.mubr.msk.f32.mxu0 %vm2750_vm0, %v2749_v0  ;;  %2209 = vmatpush3.bf16.msra.mxu0 %v2208_v20  ;;  %v2229_v20 = vpack.c.bf16 %v1226_v18, %v1225_v17  ;;  %v1557_v17 = vld [vmem:[%s3350_s3 + $0x8] sm:$0xff]  ;;  %s1807_s17 = sshll.u32 %s610_s19, 4  ;;  %s3246_s13 = scalar_lea.hbm %s3354_s26, %s2000_s18  ;;  %s3248_s17 = int_to_ptr.vmem [resolvable:$true] %s1807_s17 }
 0x111   : > { %2210 = vmatprep.subr.bf16.mxu0 %v2751_v15  ;;  %s2654_s29 = scalar_lea.vmem %s3248_s17, 128  ;;  %p3355_p9 = scmp.ne.s32.totalorder %s3353_s23, 0 }
 0x112   : > { %p2655_p6 = scmp.ne.s32.totalorder %s3248_s17, %s2654_s29  ;;  %p2661_p10 = scmp.lt.s32.totalorder %s3248_s17, %s2659_s25 }
 0x113   : > { %p2662_p2 = scmp.lt.s32.totalorder %s2660_s16, %s2654_s29 }
 0x114   : > { %2212 = vmatpush3.bf16.msra.mxu0 %v2211_v24  ;;  %p2656_p5 = pnand %p2655_p6, %p3355_p9 }
 0x115   : > { %2219 = vmatprep.subr.bf16.mxu0 %v2751_v15  ;;  %p2663_p3 = por %p2662_p2, %p2661_p10 }
 0x116   : > { %p2657_p0 = pneg %p2656_p5 }
 0x118   : > { %p2664_p4 = pnand %p2663_p3, %p2657_p0 }
 0x1db   : > { %v769_v25 = vpop.f32.mrb[0].mxu1 }
 0x1dc   : > { %v2074_v26 = vpop.f32.mrb[1].mxu1 }
 0x1de   : > { %v697_v27 = vpop.f32.mrb[0].mxu0 }
 0x1df   : > { %v770_v28 = vadd.f32 %v769_v25, %v697_v27  ;;  %v2069_v29 = vpop.f32.mrb[1].mxu0  ;;  %v1377_v27 = vld [vmem:[#allocation11 + $0x40] sm:$0xff] }
 0x1e2   : > { %v847_v31 = vpop.f32.mrb[2].mxu0 }
 0x1e3   : > { %v851_v32 = vadd.f32 %v847_v31, %v770_v28  ;;  %v2079_v33 = vpop.f32.mrb[3].mxu0 }
 0x1e5   : > { %v858_v34 = vadd.f32 %v1982_v30, %v851_v32  ;;  %v1378_v30 = vld [vmem:[#allocation11 + $0x48] sm:$0xff] }
 0x1e6   : > { %v2238_v35 = vpack.c.bf16 %v1378_v30, %v1377_v27  ;;  %v1998_v30 = vld [vmem:[%s3352_s30] ss:$0 sm:$0xff] }
 0x1e7   : > { %863 = vst.msk [vmem:[#allocation2 + $0x3] sm:$0xff] %vm859_vm4, %v858_v34 }
 0x1ee   : > { %v870_v37 = vld [vmem:[#allocation2] sm:$0xff]  ;;  %v871_v38 = vld [vmem:[#allocation2 + $0x8] sm:$0x3f] }
 0x1ef   : > { %v872_v39 = vmax.f32 %v870_v37, 0.0  ;;  %v873_v40 = vmax.f32 %v871_v38, 0.0  ;;  %v1205_v25 = vld [vmem:[#allocation2 + $0x3] sm:$0xff] }
 0x1f0   : > { %v1380_v37 = vld [vmem:[#allocation11 + $0x58] sm:$0xff] }
 0x1f1   : > { %v886_v42 = vrot.slane %v872_v39, 3  ;;  %v887_v43 = vrot.slane %v873_v40, 3  ;;  %v961_v44 = vrot.slane %v872_v39, 2  ;;  %v962_v45 = vrot.slane %v873_v40, 2 }
 0x1f2   : > { %v1042_v51 = vrot.slane %v872_v39, 4  ;;  %v1043_v52 = vrot.slane %v873_v40, 4  ;;  %v2241_v39 = vpack.c.bf16 %v1380_v37, %v1379_v36 }
 0x1f3   : > { %v888_v48 = vsel %vm885_vm6, %v886_v42, %v887_v43  ;;  %v963_v49 = vsel %vm775_vm3, %v961_v44, %v962_v45  ;;  %v1209_v43 = vld [vmem:[%s3297_s9] sm:$0xff]  ;;  %v1210_v44 = vld [vmem:[%s3297_s9 + $0x8] sm:$0xff] }
 0x1f4   : > { %2089 = vmatmul.mubr.msk.f32.vlgmr.msra.gmra.mrb[2].mxu1 %vm859_vm4, %v888_v48  ;;  %2100 = vmatmul.mubr.msk.f32.vlgmr.msra.gmra.mrb[4].mxu0 %vm859_vm4, %v963_v49  ;;  %v1044_v53 = vsel %vm1041_vm7, %v1042_v51, %v1043_v52  ;;  %v2244_v45 = vpack.c.bf16 %v1210_v44, %v1209_v43  ;;  %v2247_v48 = vpack.c.bf16 %v1212_v47, %v1211_v46 }
 0x1f5   : > { %2215 = vmatpush3.bf16.msra.mxu1 %v2214_v41  ;;  %2110 = vmatprep.mubr.msk.f32.mxu1 %vm2750_vm0, %v2749_v0 }
 0x1f6   : > { %2216 = vmatprep.subr.bf16.mxu1 %v2751_v15  ;;  %2121 = vmatprep.mubr.msk.f32.mxu0 %vm2750_vm0, %v2749_v0 }
 0x1f7   : > { %2221 = vmatpush3.bf16.msra.mxu0 %v2220_v56 }
 0x1f8   : > { %2222 = vmatprep.subr.bf16.mxu0 %v2751_v15 }
 0x1f9   : > { %2218 = vmatpush3.bf16.msra.mxu1 %v2217_v50 }
 0x1fa   : > { %2225 = vmatprep.subr.bf16.mxu1 %v2751_v15 }
 0x1fb   : > { %2224 = vmatpush3.bf16.msra.mxu0 %v2223_v59 }
 0x1fc   : > { %2111 = vmatmul.mubr.msk.f32.vlgmr.msra.gmra.mrb[4].mxu1 %vm859_vm4, %v1044_v53  ;;  %2231 = vmatprep.subr.bf16.mxu0 %v2751_v15 }
 0x1fd   : > { %2132 = vmatprep.mubr.msk.f32.mxu1 %vm2750_vm0, %v2749_v0  ;;  %2227 = vmatpush3.bf16.msra.mxu1 %v2226_v16  ;;  %v1556_v16 = vld [vmem:[%s3350_s3] sm:$0xff] }
 0x1fe   : > { %2228 = vmatprep.subr.bf16.mxu1 %v2751_v15  ;;  %v2262_v18 = vpack.c.bf16 %v1557_v17, %v1556_v16 }
 0x201   : > { %2230 = vmatpush3.bf16.msra.mxu1 %v2229_v20  ;;  %v1559_v20 = vld [vmem:[%s3350_s3 + $0x18] sm:$0xff] }
 0x202   : > { %2237 = vmatprep.subr.bf16.mxu1 %v2751_v15 }
 0x2c7   : > { %v957_v60 = vpop.f32.mrb[2].mxu1  ;;  %v1032_v61 = vpop.f32.mrb[4].mxu0 }
 0x2c8   : > { %v1033_v62 = vadd.f32 %v1032_v61, %v957_v60  ;;  %v2090_v63 = vpop.f32.mrb[3].mxu1  ;;  %v2101_v1 = vpop.f32.mrb[5].mxu0  ;;  %v1552_v60 = vld [vmem:[#allocation17] sm:$0xff]  ;;  %v1553_v61 = vld [vmem:[#allocation17 + $0x8] sm:$0xff] }
 0x2c9   : > { %v1548_v63 = vld [vmem:[#allocation15] sm:$0xff]  ;;  %v1549_v1 = vld [vmem:[#allocation15 + $0x8] sm:$0xff] }
 0x2cf   : > { %v1113_v3 = vpop.f32.mrb[4].mxu1 }
 0x2d0   : > { %v1117_v4 = vadd.f32 %v1113_v3, %v1033_v62  ;;  %v2112_v5 = vpop.f32.mrb[5].mxu1  ;;  %v2250_v62 = vpack.c.bf16 %v1553_v61, %v1552_v60  ;;  %v1554_v3 = vld [vmem:[#allocation17 + $0x10] sm:$0xff] }
 0x2d1   : > { %v1550_v5 = vld [vmem:[#allocation15 + $0x10] sm:$0xff] }
 0x2d2   : > { %v1124_v6 = vadd.f32 %v1986_v2, %v1117_v4  ;;  %v2256_v2 = vpack.c.bf16 %v1549_v1, %v1548_v63  ;;  %v1555_v4 = vld [vmem:[#allocation17 + $0x18] sm:$0xff] }
 0x2d4   : > { %v1125_v7 = vmax.f32 %v1124_v6, 0.0  ;;  %v2253_v6 = vpack.c.bf16 %v1555_v4, %v1554_v3 }
 0x2d6   : > { %2122 = vmatmul.mubr.msk.f32.vlgmr.msra.gmra.mrb[6].mxu0 %vm859_vm4, %v1125_v7  ;;  %v1551_v7 = vld [vmem:[#allocation15 + $0x18] sm:$0xff] }
 0x2d7   : > { %2143 = vmatprep.mubr.msk.f32.mxu0 %vm2750_vm0, %v2749_v0  ;;  %2233 = vmatpush3.bf16.msra.mxu0 %v2232_v11  ;;  %v2259_v8 = vpack.c.bf16 %v1551_v7, %v1550_v5 }
 0x2d8   : > { %2234 = vmatprep.subr.bf16.mxu0 %v2751_v15 }
 0x2db   : > { %2236 = vmatpush3.bf16.msra.mxu0 %v2235_v19  ;;  %v1558_v19 = vld [vmem:[%s3350_s3 + $0x10] sm:$0xff] }
 0x2dc   : > { %2243 = vmatprep.subr.bf16.mxu0 %v2751_v15 }
 0x3a9   : > { %v1201_v22 = vpop.f32.mrb[6].mxu0 }
 0x3aa   : > { %v1202_v23 = vadd.f32 %v1987_v21, %v1201_v22  ;;  %v2123_v24 = vpop.f32.mrb[7].mxu0 }
 0x3ac   : > { %v1206_v26 = vadd.f32 %v1205_v25, %v1202_v23  ;;  %v2265_v23 = vpack.c.bf16 %v1559_v20, %v1558_v19 }
 0x3ae   : > { %1207 = vst.msk [vmem:[#allocation2 + $0x3] sm:$0xff] %vm859_vm4, %v1206_v26 }
 0x3b5   : > { %v1214_v28 = vld [vmem:[#allocation2] sm:$0xff]  ;;  %v1215_v29 = vld [vmem:[#allocation2 + $0x8] sm:$0x3f] }
 0x3b6   : > { %v1216_v31 = vmax.f32 %v1214_v28, 0.0  ;;  %v1217_v32 = vmax.f32 %v1215_v29, 0.0  ;;  %v1545_v13 = vld [vmem:[#allocation2 + $0x3] sm:$0xff] }
 0x3b8   : > { %2144 = vmatmul.mubr.msk.f32.vlgmr.msra.gmra.mrb[8].mxu0 %vm859_vm4, %v1216_v31  ;;  %v1229_v33 = vrot.slane %v1216_v31, 3  ;;  %v1230_v34 = vrot.slane %v1217_v32, 3  ;;  %v1382_v40 = vrot.slane %v1216_v31, 6  ;;  %v1383_v41 = vrot.slane %v1217_v32, 6 }
 0x3b9   : > { %2165 = vmatprep.mubr.msk.f32.mxu0 %vm2750_vm0, %v2749_v0  ;;  %2245 = vmatpush3.bf16.msra.mxu0 %v2244_v45 }
 0x3ba   : > { %v1231_v38 = vsel %vm885_vm6, %v1229_v33, %v1230_v34  ;;  %v1384_v42 = vsel %vm1381_vm8, %v1382_v40, %v1383_v41  ;;  %2246 = vmatprep.subr.bf16.mxu0 %v2751_v15 }
 0x3bb   : > { %2133 = vmatmul.mubr.msk.f32.vlgmr.msra.gmra.mrb[6].mxu1 %vm859_vm4, %v1231_v38 }
 0x3bc   : > { %2239 = vmatpush3.bf16.msra.mxu1 %v2238_v35  ;;  %2154 = vmatprep.mubr.msk.f32.mxu1 %vm2750_vm0, %v2749_v0 }
 0x3bd   : > { %2240 = vmatprep.subr.bf16.mxu1 %v2751_v15  ;;  %2248 = vmatpush3.bf16.msra.mxu0 %v2247_v48 }
 0x3be   : > { %2255 = vmatprep.subr.bf16.mxu0 %v2751_v15 }
 0x3c0   : > { %2242 = vmatpush3.bf16.msra.mxu1 %v2241_v39 }
 0x3c1   : > { %2249 = vmatprep.subr.bf16.mxu1 %v2751_v15 }
 0x3c3   : > { %2155 = vmatmul.mubr.msk.f32.vlgmr.msra.gmra.mrb[8].mxu1 %vm859_vm4, %v1384_v42 }
 0x3c4   : > { %2176 = vmatprep.mubr.msk.f32.mxu1 %vm2750_vm0, %v2749_v0  ;;  %2251 = vmatpush3.bf16.msra.mxu1 %v2250_v62 }
 0x3c5   : > { %2252 = vmatprep.subr.bf16.mxu1 %v2751_v15 }
 0x3c8   : > { %2254 = vmatpush3.bf16.msra.mxu1 %v2253_v6 }
 0x3c9   : > { %2261 = vmatprep.subr.bf16.mxu1 %v2751_v15 }
 0x48b   : > { %v1372_v49 = vpop.f32.mrb[8].mxu0 }
 0x48c   : > { %v2145_v50 = vpop.f32.mrb[9].mxu0 }
 0x48e   : > { %v1300_v51 = vpop.f32.mrb[6].mxu1 }
 0x48f   : > { %v1373_v52 = vadd.f32 %v1372_v49, %v1300_v51  ;;  %v2134_v53 = vpop.f32.mrb[7].mxu1 }
 0x496   : > { %v1453_v55 = vpop.f32.mrb[8].mxu1 }
 0x497   : > { %v1457_v56 = vadd.f32 %v1453_v55, %v1373_v52  ;;  %v2156_v57 = vpop.f32.mrb[9].mxu1 }
 0x499   : > { %v1464_v58 = vadd.f32 %v1992_v54, %v1457_v56 }
 0x49b   : > { %v1465_v59 = vmax.f32 %v1464_v58, 0.0 }
 0x49d   : > { %2166 = vmatmul.mubr.msk.f32.vlgmr.msra.gmra.mrb[10].mxu0 %vm859_vm4, %v1465_v59 }
 0x49e   : > { %2187 = vmatprep.mubr.msk.f32.mxu0 %vm2750_vm0, %v2749_v0  ;;  %2257 = vmatpush3.bf16.msra.mxu0 %v2256_v2 }
 0x49f   : > { %2258 = vmatprep.subr.bf16.mxu0 %v2751_v15 }
 0x4a2   : > { %2260 = vmatpush3.bf16.msra.mxu0 %v2259_v8 }
 0x570   : > { %v1541_v10 = vpop.f32.mrb[10].mxu0 }
 0x571   : > { %v1542_v11 = vadd.f32 %v1993_v9, %v1541_v10  ;;  %v2167_v12 = vpop.f32.mrb[11].mxu0 }
 0x573   : > { %v1546_v14 = vadd.f32 %v1545_v13, %v1542_v11 }
 0x575   : > { %1547 = vst.msk [vmem:[#allocation2 + $0x3] sm:$0xff] %vm859_vm4, %v1546_v14 }
 0x57c   : > { %v1562_v21 = vld [vmem:[#allocation2 + $0x2] sm:$0xff] }
 0x57d   : > { %v1561_v22 = vld [vmem:[#allocation2 + $0x3] sm:$0xff]  ;;  %2177 = vmatmul.mubr.msk.f32.vlgmr.msra.gmra.mrb[10].mxu1 %vm859_vm4, %v1562_v21 }
 0x57e   : > { %2188 = vmatmul.mubr.msk.f32.vlgmr.msra.gmra.mrb[12].mxu0 %vm859_vm4, %v1561_v22  ;;  %2263 = vmatpush3.bf16.msra.mxu1 %v2262_v18  ;;  %v1709_v24 = vld [vmem:[#allocation2 + $0x4] sm:$0xff] }
 0x57f   : > { %2198 = vmatprep.mubr.msk.f32.mxu1 %vm2750_vm0, %v2749_v0  ;;  %2264 = vmatprep.subr.bf16.mxu1 %v2751_v15 }
 0x582   : > { %2266 = vmatpush3.bf16.msra.mxu1 %v2265_v23 }
 0x585   : > { %2199 = vmatmul.mubr.msk.f32.vlgmr.msra.gmra.mrb[12].mxu1 %vm859_vm4, %v1709_v24 }
 0x650   : > { %v1632_v25 = vpop.f32.mrb[10].mxu1 }
 0x651   : > { %v1705_v26 = vpop.f32.mrb[12].mxu0  ;;  %v2178_v28 = vpop.f32.mrb[11].mxu1 }
 0x652   : > { %v1706_v27 = vadd.f32 %v1705_v26, %v1632_v25  ;;  %v2189_v29 = vpop.f32.mrb[13].mxu0 }
 0x658   : > { %v1779_v31 = vpop.f32.mrb[12].mxu1 }
 0x659   : > { %v1783_v0 = vadd.f32 %v1779_v31, %v1706_v27  ;;  %v2200_v15 = vpop.f32.mrb[13].mxu1 }
 0x65b   : > { %v1790_v32 = vadd.f32 %v1998_v30, %v1783_v0 }
 0x65d   : > { %1792 = vst.msk [vmem:[%s610_s19] sm:$0xff] %vm1791_vm9, %v1790_v32 }
 0x65e   : > { %2667 = shalt.err (!%p2664_p4)
}
 0x65f   : > { %s2668_s21 = scalar_lea.hbm %s3246_s13, 128  ;;  %s2672_s15 = scalar_lea.hbm %s3354_s26, 256 }
 0x660   : > { %p2669_p12 = scmp.ne.s32.totalorder %s3246_s13, %s2668_s21  ;;  %p2673_p11 = scmp.lt.u32.totalorder %s3246_s13, %s3354_s26 }
 0x661   : > { %p2674_p13 = scmp.lt.u32.totalorder %s2672_s15, %s2668_s21  ;;  %p2676_p6 = scmp.lt.u32.totalorder %s2668_s21, %s3246_s13 }
 0x662   : > { %p2670_p7 = pnand %p2669_p12, %p3355_p9 }
 0x663   : > { %p2675_p1 = por %p2674_p13, %p2673_p11 }
 0x664   : > { %p2671_p8 = pneg %p2670_p7 }
 0x665   : > { %p2677_p5 = por %p2676_p6, %p2675_p1 }
 0x667   : > { %p2678_p0 = pnand %p2677_p5, %p2671_p8 }
 0x669   : > { %2681 = shalt.err (!%p2678_p0)
}
 0x66a   : > { %2303 = dma.vmem_to_hbm [thread:$0]  (%p3355_p9), %s3248_s17, 128, %s3246_s13, %s1794_s20  }
 0x66b PF: > { %s3356_s19 = sld [smem:[#allocation28_spill]]  ;;  %s3357_s28 = sld [smem:[#allocation25_spill]] }
 0x66c   : > { %s3358_s14 = sld [smem:[#allocation32_spill]] }
 0x671   : > { %p2355_p10 = scmp.ge.s32.totalorder %s3356_s19, 2  ;;  %s1819_s29 = sand.u32 1, %s3357_s28  }
 0x672   : > { %p3359_p2 = scmp.ne.s32.totalorder %s3358_s14, 0  ;;  %s1820_s22 = scalar_lea.sflag [#allocation5], %s1819_s29 }
 0x674   : > { %p2334_p3 = pnand %p2355_p10, %p3359_p2 }
 0x676   : > { %2719 = dma.done.wait (!%p2334_p3), %s1820_s22, 128  }
 0x677   : > { %2721 = vsyncadd (!%p2334_p3), %s1820_s22, 4294967168  ;;  %s3360_s21 = sld [smem:[#allocation29_spill]]  ;;  %s3361_s18 = sld [smem:[#allocation26_spill]] }
 0x678   : > { %s3362_s19 = sld [smem:[#allocation27_spill]]  ;;  %s3363_s20 = sld [smem:[#allocation30_spill]] }
 0x67d   : > { %p30_p4 = scmp.ge.s32.totalorder %s3360_s21, 4  }
 0x67f   :  { %32 = sbr.rel (!%p30_p4) target bundleno = 13 (0xd), region = 158 }
 0x686   :  { %1825 = vsyncpa [#allocation4], 1 }
 0x687   :  { %1827 = vsyncpa [#allocation4 + $0x1], 1 }
 0x688   :  { %1828 = vsyncpa [#allocation7], 1 }
 0x689   :  { %1829 = vsyncpa [#allocation10], 1 }
 0x68a   :  { %1830 = vsyncpa [#allocation13], 1 }
 0x68b   :  { %1831 = vsyncpa [#allocation16], 1 }
 0x68c   :  { %1832 = vsyncpa [#allocation5], 1 }
 0x68d   :  { %1834 = vsyncpa [#allocation5 + $0x1], 1 }

</bundles_post_ra>
